<compile_context>
chip_gen: v6e
topology: v6e:2x2x1
jax: 0.10.0
libtpu: 0.0.40
codegen_flags: <defaults>
</compile_context>

<pallas_src>
import functools

import jax
import jax.numpy as jnp
from jax.experimental import pallas as pl
from jax.experimental.pallas import tpu as pltpu


def _round_up(n: int, m: int) -> int:
    return (n + m - 1) // m * m


def dnn_kernel(x_ref, w1_ref, b1_ref, w2_ref, b2_ref, o_ref):
    # hidden = relu(x @ W1 + b1)   (f32 accumulation on the MXU)
    h = jnp.dot(x_ref[...], w1_ref[...], preferred_element_type=jnp.float32)
    h = jnp.maximum(h + b1_ref[...], 0.0)          # b1 is (1, H) -> broadcasts
    # out = sigmoid(h @ W2 + b2)
    o = jnp.dot(h.astype(w2_ref.dtype), w2_ref[...],
                preferred_element_type=jnp.float32)
    o = o + b2_ref[...]
    o_ref[...] = jax.nn.sigmoid(o).astype(o_ref.dtype)


@functools.partial(jax.jit, static_argnames=("block_b", "compute_dtype"))
def dnn_forward(x, w1, b1, w2, b2, *, block_b=256, compute_dtype=jnp.bfloat16):
    B, in_dim = x.shape
    hid = w1.shape[1]
    out_dim = w2.shape[1]
    assert w1.shape[0] == in_dim and w2.shape[0] == hid
    assert b1.shape == (hid,) and b2.shape == (out_dim,)

    LANE, SUB = 128, 8
    in_p = _round_up(in_dim, LANE)
    hid_p = _round_up(hid, LANE)
    out_p = _round_up(out_dim, LANE)

    # Batch tile: multiple of 8 sublanes, capped by block_b; pad B to a multiple.
    tb = _round_up(min(block_b, _round_up(B, SUB)), SUB)
    b_p = _round_up(B, tb)

    # Cast to compute dtype and zero-pad to lane-dense shapes.
    xp = jnp.zeros((b_p, in_p), compute_dtype).at[:B, :in_dim].set(
        x.astype(compute_dtype))
    w1p = jnp.zeros((in_p, hid_p), compute_dtype).at[:in_dim, :hid].set(
        w1.astype(compute_dtype))
    w2p = jnp.zeros((hid_p, out_p), compute_dtype).at[:hid, :out_dim].set(
        w2.astype(compute_dtype))
    b1p = jnp.zeros((1, hid_p), jnp.float32).at[0, :hid].set(
        b1.astype(jnp.float32))
    b2p = jnp.zeros((1, out_p), jnp.float32).at[0, :out_dim].set(
        b2.astype(jnp.float32))

    grid = (b_p // tb,)
    out_padded = pl.pallas_call(
        dnn_kernel,
        out_shape=jax.ShapeDtypeStruct((b_p, out_p), jnp.float32),
        grid=grid,
        in_specs=[
            pl.BlockSpec((tb, in_p), lambda i: (i, 0)),      # x: batch-tiled
            pl.BlockSpec((in_p, hid_p), lambda i: (0, 0)),   # W1: resident
            pl.BlockSpec((1, hid_p), lambda i: (0, 0)),      # b1: resident
            pl.BlockSpec((hid_p, out_p), lambda i: (0, 0)),  # W2: resident
            pl.BlockSpec((1, out_p), lambda i: (0, 0)),      # b2: resident
        ],
        out_specs=pl.BlockSpec((tb, out_p), lambda i: (i, 0)),
        compiler_params=pltpu.CompilerParams(
            dimension_semantics=("parallel",),
        ),
    )(xp, w1p, b1p, w2p, b2p)

    # Drop batch / output-lane padding.
    return out_padded[:B, :out_dim]


if __name__ == "__main__":
    # Small shapes consistent with the module's forward.
    batch, input_dim, hidden_dim, output_dim = 64, 32, 64, 16

    key = jax.random.PRNGKey(0)
    kx, k1, kb1, k2, kb2 = jax.random.split(key, 5)

    x = jax.random.normal(kx, (batch, input_dim), dtype=jnp.float32)

    # Deterministic parameter init mimicking nn.Linear's uniform(-1/sqrt(in), 1/sqrt(in)).
    bound1 = 1.0 / jnp.sqrt(input_dim)
    bound2 = 1.0 / jnp.sqrt(hidden_dim)
    # Weights kept as (in, out) so the kernel does `x @ W` (== PyTorch x @ W^T).
    w1 = jax.random.uniform(k1, (input_dim, hidden_dim), jnp.float32, -bound1, bound1)
    b1 = jax.random.uniform(kb1, (hidden_dim,), jnp.float32, -bound1, bound1)
    w2 = jax.random.uniform(k2, (hidden_dim, output_dim), jnp.float32, -bound2, bound2)
    b2 = jax.random.uniform(kb2, (output_dim,), jnp.float32, -bound2, bound2)

    ref = jax.nn.sigmoid(jnp.maximum(x @ w1 + b1, 0.0) @ w2 + b2)

    # f32 compute path: tight check of the kernel structure / tiling.
    out_f32 = dnn_forward(x, w1, b1, w2, b2, block_b=32, compute_dtype=jnp.float32)
    jax.block_until_ready(out_f32)
    assert out_f32.shape == (batch, output_dim)
    assert jnp.allclose(out_f32, ref, atol=1e-5, rtol=1e-5)

    # bf16 compute / f32 accumulate path (default, perf-oriented): looser check.
    out_bf16 = dnn_forward(x, w1, b1, w2, b2, block_b=32)
    jax.block_until_ready(out_bf16)
    assert out_bf16.shape == (batch, output_dim)
    assert jnp.allclose(out_bf16, ref, atol=2e-2, rtol=2e-2)

    print("KERNEL_OK")
</pallas_src>

<mosaic_0001>
module attributes {stable_mosaic.version = 11 : i64} {
  func.func @dnn_kernel(%arg0: i32, %arg1: memref<32x128xf32, #tpu.memory_space<vmem>>, %arg2: memref<128x128xf32, #tpu.memory_space<vmem>>, %arg3: memref<1x128xf32, #tpu.memory_space<vmem>>, %arg4: memref<128x128xf32, #tpu.memory_space<vmem>>, %arg5: memref<1x128xf32, #tpu.memory_space<vmem>>, %arg6: memref<32x128xf32, #tpu.memory_space<vmem>>) attributes {dimension_semantics = [#tpu.dimension_semantics<parallel>], iteration_bounds = array<i64: 2>, scalar_prefetch = 0 : i64, scratch_operands = 0 : i64, tpu.core_type = #tpu.core_type<tc>, window_params = [{transform_indices = @transform_0, window_bounds = array<i64: 32, 128>}, {pipeline_mode = #tpu.pipeline_mode<synchronous>, transform_indices = @transform_1, window_bounds = array<i64: 128, 128>}, {pipeline_mode = #tpu.pipeline_mode<synchronous>, transform_indices = @transform_2, window_bounds = array<i64: 1, 128>}, {pipeline_mode = #tpu.pipeline_mode<synchronous>, transform_indices = @transform_3, window_bounds = array<i64: 128, 128>}, {pipeline_mode = #tpu.pipeline_mode<synchronous>, transform_indices = @transform_4, window_bounds = array<i64: 1, 128>}, {transform_indices = @transform_5, window_bounds = array<i64: 32, 128>}]} {
    %c0 = arith.constant 0 : index
    %c0_0 = arith.constant 0 : index
    %0 = vector.load %arg1[%c0, %c0_0] : memref<32x128xf32, #tpu.memory_space<vmem>>, vector<32x128xf32>
    %c0_1 = arith.constant 0 : index
    %c0_2 = arith.constant 0 : index
    %1 = vector.load %arg2[%c0_1, %c0_2] : memref<128x128xf32, #tpu.memory_space<vmem>>, vector<128x128xf32>
    %cst = arith.constant dense<0.000000e+00> : vector<32x128xf32>
    %2 = tpu.matmul %0, %1, %cst {dimension_numbers = #tpu.dot_dimension_numbers<[1], [0], [0], [1], [0, 0, 1, 1], [], []>} : vector<32x128xf32>, vector<128x128xf32>, vector<32x128xf32> -> vector<32x128xf32>
    %c0_3 = arith.constant 0 : index
    %c0_4 = arith.constant 0 : index
    %3 = vector.load %arg3[%c0_3, %c0_4] : memref<1x128xf32, #tpu.memory_space<vmem>>, vector<1x128xf32>
    %4 = vector.broadcast %3 : vector<1x128xf32> to vector<32x128xf32>
    %5 = arith.addf %2, %4 : vector<32x128xf32>
    %cst_5 = arith.constant 0.000000e+00 : f32
    %6 = vector.broadcast %cst_5 : f32 to vector<32x128xf32>
    %7 = arith.maximumf %5, %6 : vector<32x128xf32>
    %c0_6 = arith.constant 0 : index
    %c0_7 = arith.constant 0 : index
    %8 = vector.load %arg4[%c0_6, %c0_7] : memref<128x128xf32, #tpu.memory_space<vmem>>, vector<128x128xf32>
    %cst_8 = arith.constant dense<0.000000e+00> : vector<32x128xf32>
    %9 = tpu.matmul %7, %8, %cst_8 {dimension_numbers = #tpu.dot_dimension_numbers<[1], [0], [0], [1], [0, 0, 1, 1], [], []>} : vector<32x128xf32>, vector<128x128xf32>, vector<32x128xf32> -> vector<32x128xf32>
    %c0_9 = arith.constant 0 : index
    %c0_10 = arith.constant 0 : index
    %10 = vector.load %arg5[%c0_9, %c0_10] : memref<1x128xf32, #tpu.memory_space<vmem>>, vector<1x128xf32>
    %11 = vector.broadcast %10 : vector<1x128xf32> to vector<32x128xf32>
    %12 = arith.addf %9, %11 : vector<32x128xf32>
    %13 = arith.negf %12 : vector<32x128xf32>
    %14 = math.exp %13 : vector<32x128xf32>
    %cst_11 = arith.constant 1.000000e+00 : f32
    %15 = vector.broadcast %cst_11 : f32 to vector<32x128xf32>
    %16 = arith.addf %15, %14 : vector<32x128xf32>
    %17 = arith.divf %15, %16 : vector<32x128xf32>
    %c0_12 = arith.constant 0 : index
    %c0_13 = arith.constant 0 : index
    %18 = vector.load %arg6[%c0_12, %c0_13] : memref<32x128xf32, #tpu.memory_space<vmem>>, vector<32x128xf32>
    tpu.vector_store %arg6[%c0_12, %c0_13], %17 {strides = array<i32>} : memref<32x128xf32, #tpu.memory_space<vmem>>, vector<32x128xf32>,
    return
  }
  func.func @transform_0(%arg0: i32) -> (i32, i32) {
    %c0_i32 = arith.constant 0 : i32
    %c0_i32_0 = arith.constant 0 : i32
    return %arg0, %c0_i32 : i32, i32
  }
  func.func @transform_1(%arg0: i32) -> (i32, i32) {
    %c0_i32 = arith.constant 0 : i32
    %c0_i32_0 = arith.constant 0 : i32
    %c0_i32_1 = arith.constant 0 : i32
    return %c0_i32, %c0_i32_0 : i32, i32
  }
  func.func @transform_2(%arg0: i32) -> (i32, i32) {
    %c0_i32 = arith.constant 0 : i32
    %c0_i32_0 = arith.constant 0 : i32
    %c0_i32_1 = arith.constant 0 : i32
    return %c0_i32, %c0_i32_0 : i32, i32
  }
  func.func @transform_3(%arg0: i32) -> (i32, i32) {
    %c0_i32 = arith.constant 0 : i32
    %c0_i32_0 = arith.constant 0 : i32
    %c0_i32_1 = arith.constant 0 : i32
    return %c0_i32, %c0_i32_0 : i32, i32
  }
  func.func @transform_4(%arg0: i32) -> (i32, i32) {
    %c0_i32 = arith.constant 0 : i32
    %c0_i32_0 = arith.constant 0 : i32
    %c0_i32_1 = arith.constant 0 : i32
    return %c0_i32, %c0_i32_0 : i32, i32
  }
  func.func @transform_5(%arg0: i32) -> (i32, i32) {
    %c0_i32 = arith.constant 0 : i32
    %c0_i32_0 = arith.constant 0 : i32
    return %arg0, %c0_i32 : i32, i32
  }
}

</mosaic_0001>

<bundles_post_ra>
// kernel: dnn_forward.1
= control target key start
LH: loop header
LB: loop body
LE: loop exit
PB: predicated region body
PF: predicated region fallthrough
CT: control target
= control target key end

     0   :  { %s731_s18 = smov 0   ;;  %s863_s0 = inlined_call_operand.vmem [shape: f32[64,128], index: 0, kind: input, shape index: {}]   ;;  %s864_s1 = inlined_call_operand.vmem [shape: f32[128,128], index: 1, kind: input, shape index: {}]   ;;  %s865_s2 = inlined_call_operand.vmem [shape: f32[1,128], index: 2, kind: input, shape index: {}]   ;;  %s866_s3 = inlined_call_operand.vmem [shape: f32[128,128], index: 3, kind: input, shape index: {}]   ;;  %s867_s4 = inlined_call_operand.vmem [shape: f32[1,128], index: 4, kind: input, shape index: {}]   ;;  %s868_s5 = inlined_call_operand.vmem [shape: f32[64,128], index: 5, kind: output, shape index: {}]  }
   0x1 LB: > { %s536_s19 = sadd.s32 4294967295, %s699_s18   ;;  %p540_p0 = scmp.ge.s32.totalorder %s699_s18, 1  ;;  %s699_s18 = sphi %s731_s18, %s15_s18  }
   0x2   : > { %p188_p1 = scmp.lt.s32.totalorder %s699_s18, 3 }
   0x4   : > { %p189_p2 = pnand %p540_p0, %p188_p1 }
   0x5   : > { %s541_s24 = sshll.u32 (!%p189_p2), %s536_s19, 2 }
   0x6   : > { %192 = sbr.rel (%p189_p2) target bundleno = 479 (0x1df), region = 40  ;;  %p217_p3 = scmp.lt.s32.totalorder (!%p189_p2), %s541_s24, 7 }
   0xb   : > { %v247_v0 = vld [vmem:[%s864_s1 + $0x78] sm:$0xff]  ;;  %v246_v1 = vld [vmem:[%s864_s1 + $0x70] sm:$0xff]  ;;  %v245_v2 = vld [vmem:[%s864_s1 + $0x68] sm:$0xff]  ;;  %s870_s24 = smov (!%p217_p3, %s541_s24), 7 }
   0xc   : > { %593 = vmatprep.subr.mxu0 %v247_v0  ;;  %v244_v3 = vld [vmem:[%s864_s1 + $0x60] sm:$0xff]  ;;  %s542_s29 = sshll.u32 %s870_s24, 3  ;;  %v359_v4 = vld [vmem:[%s866_s3 + $0x78] sm:$0xff]  ;;  %v358_v6 = vld [vmem:[%s866_s3 + $0x70] sm:$0xff] }
   0xd   : > { %594 = vmatpush3.msra.mxu0 %v247_v0  ;;  %v243_v5 = vld [vmem:[%s864_s1 + $0x58] sm:$0xff]  ;;  %s765_s11 = scalar_lea.vmem %s863_s0, %s542_s29  ;;  %631 = vmatprep.subr.mxu1 %v359_v4  ;;  %v242_v8 = vld [vmem:[%s864_s1 + $0x50] sm:$0xff]  ;;  %v357_v9 = vld [vmem:[%s866_s3 + $0x68] sm:$0xff]  ;;  %s226_s30 = scalar_lea.vmem %s868_s5, %s542_s29 }
   0xe   : > { %595 = vmatprep.subr.mxu0 %v246_v1  ;;  %v228_v7 = vld [vmem:[%s765_s11] sm:$0xff]  ;;  %632 = vmatpush3.msra.mxu1 %v359_v4  ;;  %v241_v10 = vld [vmem:[%s864_s1 + $0x48] sm:$0xff]  ;;  %v355_v13 = vld [vmem:[%s866_s3 + $0x58] sm:$0xff] }
   0xf   : > { %596 = vmatpush3.msra.mxu0 %v246_v1  ;;  %625 = vmatprep.mubr.f32.mxu0 %v228_v7  ;;  %v356_v11 = vld [vmem:[%s866_s3 + $0x60] sm:$0xff]  ;;  %v239_v14 = vld [vmem:[%s864_s1 + $0x38] sm:$0xff]  ;;  %v354_v15 = vld [vmem:[%s866_s3 + $0x50] sm:$0xff] }
  0x10   : > { %597 = vmatprep.subr.mxu0 %v245_v2  ;;  %633 = vmatprep.subr.mxu1 %v358_v6  ;;  %v240_v12 = vld [vmem:[%s864_s1 + $0x40] sm:$0xff]  ;;  %v238_v16 = vld [vmem:[%s864_s1 + $0x30] sm:$0xff]  ;;  %v353_v17 = vld [vmem:[%s866_s3 + $0x48] sm:$0xff] }
  0x11   : > { %598 = vmatpush3.msra.mxu0 %v245_v2  ;;  %634 = vmatpush3.msra.mxu1 %v358_v6  ;;  %v237_v18 = vld [vmem:[%s864_s1 + $0x28] sm:$0xff]  ;;  %v352_v19 = vld [vmem:[%s866_s3 + $0x40] sm:$0xff]  ;;  %v351_v21 = vld [vmem:[%s866_s3 + $0x38] sm:$0xff] }
  0x12   : > { %599 = vmatprep.subr.mxu0 %v244_v3  ;;  %635 = vmatprep.subr.mxu1 %v357_v9  ;;  %v236_v20 = vld [vmem:[%s864_s1 + $0x20] sm:$0xff]  ;;  %v235_v22 = vld [vmem:[%s864_s1 + $0x18] sm:$0xff]  ;;  %v350_v23 = vld [vmem:[%s866_s3 + $0x30] sm:$0xff] }
  0x13   : > { %600 = vmatpush3.msra.mxu0 %v244_v3  ;;  %636 = vmatpush3.msra.mxu1 %v357_v9  ;;  %v234_v24 = vld [vmem:[%s864_s1 + $0x10] sm:$0xff]  ;;  %v349_v25 = vld [vmem:[%s866_s3 + $0x28] sm:$0xff]  ;;  %v348_v27 = vld [vmem:[%s866_s3 + $0x20] sm:$0xff] }
  0x14   : > { %601 = vmatprep.subr.mxu0 %v243_v5  ;;  %637 = vmatprep.subr.mxu1 %v356_v11  ;;  %v233_v26 = vld [vmem:[%s864_s1 + $0x8] sm:$0xff]  ;;  %v232_v28 = vld [vmem:[%s864_s1] sm:$0xff]  ;;  %v230_v30 = vld [vmem:[%s765_s11 + $0x10] sm:$0xff] }
  0x15   : > { %602 = vmatpush3.msra.mxu0 %v243_v5  ;;  %638 = vmatpush3.msra.mxu1 %v356_v11  ;;  %v229_v29 = vld [vmem:[%s765_s11 + $0x8] sm:$0xff]  ;;  %v231_v31 = vld [vmem:[%s765_s11 + $0x18] sm:$0xff]  ;;  %v346_v33 = vld [vmem:[%s866_s3 + $0x10] sm:$0xff] }
  0x16   : > { %603 = vmatprep.subr.mxu0 %v242_v8  ;;  %639 = vmatprep.subr.mxu1 %v355_v13  ;;  %v347_v32 = vld [vmem:[%s866_s3 + $0x18] sm:$0xff]  ;;  %v345_v34 = vld [vmem:[%s866_s3 + $0x8] sm:$0xff]  ;;  %v344_v35 = vld [vmem:[%s866_s3] sm:$0xff] }
  0x17   : > { %604 = vmatpush3.msra.mxu0 %v242_v8  ;;  %640 = vmatpush3.msra.mxu1 %v355_v13  ;;  %v545_v36 = vld [vmem:[%s865_s2] ss:$0 sm:$0xff] }
  0x18   : > { %605 = vmatprep.subr.mxu0 %v241_v10  ;;  %641 = vmatprep.subr.mxu1 %v354_v15  ;;  %v546_v49 = vld [vmem:[%s867_s4] ss:$0 sm:$0xff] }
  0x19   : > { %606 = vmatpush3.msra.mxu0 %v241_v10  ;;  %642 = vmatpush3.msra.mxu1 %v354_v15 }
  0x1a   : > { %607 = vmatprep.subr.mxu0 %v240_v12  ;;  %643 = vmatprep.subr.mxu1 %v353_v17 }
  0x1b   : > { %608 = vmatpush3.msra.mxu0 %v240_v12  ;;  %644 = vmatpush3.msra.mxu1 %v353_v17 }
  0x1c   : > { %609 = vmatprep.subr.mxu0 %v239_v14  ;;  %645 = vmatprep.subr.mxu1 %v352_v19 }
  0x1d   : > { %610 = vmatpush3.msra.mxu0 %v239_v14  ;;  %646 = vmatpush3.msra.mxu1 %v352_v19 }
  0x1e   : > { %611 = vmatprep.subr.mxu0 %v238_v16  ;;  %647 = vmatprep.subr.mxu1 %v351_v21 }
  0x1f   : > { %612 = vmatpush3.msra.mxu0 %v238_v16  ;;  %648 = vmatpush3.msra.mxu1 %v351_v21 }
  0x20   : > { %613 = vmatprep.subr.mxu0 %v237_v18  ;;  %649 = vmatprep.subr.mxu1 %v350_v23 }
  0x21   : > { %614 = vmatpush3.msra.mxu0 %v237_v18  ;;  %650 = vmatpush3.msra.mxu1 %v350_v23 }
  0x22   : > { %615 = vmatprep.subr.mxu0 %v236_v20  ;;  %651 = vmatprep.subr.mxu1 %v349_v25 }
  0x23   : > { %616 = vmatpush3.msra.mxu0 %v236_v20  ;;  %652 = vmatpush3.msra.mxu1 %v349_v25 }
  0x24   : > { %617 = vmatprep.subr.mxu0 %v235_v22  ;;  %653 = vmatprep.subr.mxu1 %v348_v27 }
  0x25   : > { %618 = vmatpush3.msra.mxu0 %v235_v22  ;;  %654 = vmatpush3.msra.mxu1 %v348_v27 }
  0x26   : > { %619 = vmatprep.subr.mxu0 %v234_v24  ;;  %655 = vmatprep.subr.mxu1 %v347_v32 }
  0x27   : > { %620 = vmatpush3.msra.mxu0 %v234_v24  ;;  %656 = vmatpush3.msra.mxu1 %v347_v32 }
  0x28   : > { %621 = vmatprep.subr.mxu0 %v233_v26  ;;  %657 = vmatprep.subr.mxu1 %v346_v33 }
  0x29   : > { %622 = vmatpush3.msra.mxu0 %v233_v26  ;;  %658 = vmatpush3.msra.mxu1 %v346_v33 }
  0x2a   : > { %623 = vmatprep.subr.mxu0 %v232_v28  ;;  %659 = vmatprep.subr.mxu1 %v345_v34 }
  0x2b   : > { %624 = vmatpush3.msra.mxu0 %v232_v28  ;;  %660 = vmatpush3.msra.mxu1 %v345_v34 }
  0x2c   : > { %626 = vmatmul.mubr.f32.vlgmr.msra.gmra.mxu0 %v229_v29  ;;  %661 = vmatprep.subr.mxu1 %v344_v35 }
  0x2d   : > { %628 = vmatprep.mubr.f32.mxu0 %v230_v30  ;;  %662 = vmatpush3.msra.mxu1 %v344_v35 }
  0x30   : > { %629 = vmatmul.mubr.f32.gmra.mxu0 %v231_v31 }
  0xec   : > { %v627_v37 = vpop.f32.mrf.mxu0 }
  0xed   : > { %v327_v38 = vadd.f32 %v627_v37, %v545_v36 }
  0xee   : > { %v321_v39 = vpop.f32.mrf.mxu0 }
  0xef   : > { %v322_v40 = vadd.f32 %v545_v36, %v321_v39  ;;  %v341_v43 = vmax.f32 %v327_v38, 0.0 }
  0xf0   : > { %v630_v41 = vpop.f32.mrf.mxu0 }
  0xf1   : > { %v340_v42 = vmax.f32 %v322_v40, 0.0  ;;  %v337_v44 = vadd.f32 %v630_v41, %v545_v36 }
  0xf2   : > { %v331_v45 = vpop.f32.mrf.mxu0 }
  0xf3   : > { %v332_v46 = vadd.f32 %v545_v36, %v331_v45  ;;  %663 = vmatprep.mubr.f32.mxu1 %v340_v42  ;;  %v343_v48 = vmax.f32 %v337_v44, 0.0 }
  0xf4   : > { %664 = vmatmul.mubr.f32.vlgmr.msra.gmra.mxu1 %v341_v43 }
  0xf5   : > { %v342_v47 = vmax.f32 %v332_v46, 0.0 }
  0xf7   : > { %666 = vmatprep.mubr.f32.mxu1 %v342_v47 }
  0xf8   : > { %667 = vmatmul.mubr.f32.gmra.mxu1 %v343_v48 }
 0x1b4   : > { %v665_v50 = vpop.f32.mrf.mxu1 }
 0x1b5   : > { %v439_v51 = vadd.f32 %v665_v50, %v546_v49 }
 0x1b6   : > { %v433_v52 = vpop.f32.mrf.mxu1 }
 0x1b7   : > { %v548_v53 = vmul.f32 -1.442695, %v439_v51  ;;  %v434_v54 = vadd.f32 %v546_v49, %v433_v52 }
 0x1b8   : > { %v668_v55 = vpop.f32.mrf.mxu1 }
 0x1b9   : > { %677 = vpow2.f32 %v548_v53  ;;  %v547_v56 = vmul.f32 -1.442695, %v434_v54  ;;  %v449_v57 = vadd.f32 %v668_v55, %v546_v49 }
 0x1ba   : > { %v443_v58 = vpop.f32.mrf.mxu1 }
 0x1bb   : > { %679 = vpow2.f32 %v547_v56  ;;  %v550_v59 = vmul.f32 -1.442695, %v449_v57  ;;  %v444_v60 = vadd.f32 %v546_v49, %v443_v58 }
 0x1bd   : > { %681 = vpow2.f32 %v550_v59  ;;  %v549_v61 = vmul.f32 -1.442695, %v444_v60 }
 0x1bf   : > { %683 = vpow2.f32 %v549_v61 }
 0x1c6   : > { %v678_v62 = vpop.eup %677 }
 0x1c7   : > { %v465_v0 = vadd.f32 1.0, %v678_v62 }
 0x1c8   : > { %v680_v63 = vpop.eup %679 }
 0x1c9   : > { %v464_v1 = vadd.f32 1.0, %v680_v63 }
 0x1ca   : > { %v682_v2 = vpop.eup %681 }
 0x1cb   : > { %685 = vrcp.f32 %v464_v1  ;;  %v467_v4 = vadd.f32 1.0, %v682_v2 }
 0x1cc   : > { %v684_v3 = vpop.eup %683  ;;  %687 = vrcp.f32 %v465_v0 }
 0x1cd   : > { %v466_v5 = vadd.f32 1.0, %v684_v3 }
 0x1cf   : > { %689 = vrcp.f32 %v466_v5 }
 0x1d0   : > { %691 = vrcp.f32 %v467_v4 }
 0x1d8   : > { %v686_v6 = vpop.eup %685 }
 0x1d9   : > { %v688_v7 = vpop.eup %687  ;;  %476 = vst [vmem:[%s226_s30] sm:$0xff] %v686_v6 }
 0x1da   : > { %477 = vst [vmem:[%s226_s30 + $0x8] sm:$0xff] %v688_v7 }
 0x1dc   : > { %v690_v8 = vpop.eup %689 }
 0x1dd   : > { %v692_v9 = vpop.eup %691  ;;  %478 = vst [vmem:[%s226_s30 + $0x10] sm:$0xff] %v690_v8 }
 0x1de   : > { %479 = vst [vmem:[%s226_s30 + $0x18] sm:$0xff] %v692_v9 }
 0x1df PF: > { %s15_s18 = sadd.s32 1, %s699_s18  }
 0x1e0   : > { %p12_p4 = scmp.ge.s32.totalorder %s15_s18, 4  }
 0x1e2   :  { %14 = sbr.rel (!%p12_p4) target bundleno = 1 (0x1), region = 70 }

</bundles_post_ra>
